<compile_context>
chip_gen: v5e
topology: v5e:2x2
jax: 0.10.0
libtpu: 0.0.40
codegen_flags: <defaults>
</compile_context>

<pallas_src>
import jax
import jax.numpy as jnp
from jax.experimental import pallas as pl
from jax.experimental.pallas import tpu as pltpu


def _round_up(x, m):
    return (x + m - 1) // m * m


def affine_kernel(x_ref, w_ref, b_ref, o_ref):
    """out = x @ W + b for tiny, static K/N via VPU broadcast-FMAs.

    K (=2) and N (=4) are compile-time constants, so the matmul unrolls into
    K multiply-adds on the VPU: no MXU push, no 128-lane padding of K or N,
    and x / out move HBM<->VMEM at their natural (unpadded) widths.
    Accumulation is f32 regardless of the input dtype.
    """
    k = x_ref.shape[1]
    x = x_ref[...]                                   # (tm, K)
    w = w_ref[...]                                   # (K, N)
    acc = jnp.broadcast_to(b_ref[...].astype(jnp.float32), o_ref.shape)
    for kk in range(k):                              # static, fully unrolled
        acc = acc + (x[:, kk:kk + 1].astype(jnp.float32)
                     * w[kk:kk + 1, :].astype(jnp.float32))
    o_ref[...] = acc.astype(o_ref.dtype)


def blob_model_forward(x, params, *, tm_max=4096, compute_dtype=None):
    """Forward pass of blobModel.

    x: [batch, input_features].
    params: dict w1,b1,w2,b2,w3,b3; weights stored [in, out] (transposed vs.
    PyTorch's [out, in]), biases [1, out].
    compute_dtype: optional low-precision dtype (e.g. jnp.bfloat16 on
    v6e/v7x) for x/W/b to halve HBM traffic on this mem-bound kernel.
    """
    w1, b1 = params["w1"], params["b1"]
    w2, b2 = params["w2"], params["b2"]
    w3, b3 = params["w3"], params["b3"]

    # Collapse the activation-free 3-layer stack into one exact affine
    # (three tiny dots in the wrapper; recomputed per call under jit).
    hp = jax.lax.Precision.HIGHEST
    w = jnp.dot(jnp.dot(w1, w2, precision=hp), w3, precision=hp)             # (K, N)
    b = jnp.dot(jnp.dot(b1, w2, precision=hp) + b2, w3, precision=hp) + b3   # (1, N)

    out_dtype = x.dtype
    if compute_dtype is not None:
        x = x.astype(compute_dtype)
        w = w.astype(compute_dtype)
        b = b.astype(compute_dtype)

    batch, k = x.shape
    n = w.shape[1]

    # Row tiling only.  x/out keep tiny lane widths, so per-tile VMEM is a few
    # hundred KB even at tm=4096 (no vmem_limit_bytes override needed, incl.
    # v5e's 16 MiB scoped default).
    batch8 = _round_up(batch, 8)
    tm = min(batch8, tm_max)
    if batch8 >= 16:
        # >=2 grid steps so the "parallel" batch axis feeds both v7x cores.
        tm = min(tm, _round_up(pl.cdiv(batch8, 2), 8))
    # Cap row-padding waste for batch sizes just above a tile boundary.
    while tm > 8 and (_round_up(batch8, tm) - batch8) > max(batch8 // 8, 8):
        tm = max(8, _round_up(tm // 2, 8))
    batch_pad = _round_up(batch8, tm)

    if batch_pad != batch:
        x_in = jnp.zeros((batch_pad, k), x.dtype).at[:batch, :].set(x)
    else:
        x_in = x

    grid = (batch_pad // tm,)

    out_p = pl.pallas_call(
        affine_kernel,
        out_shape=jax.ShapeDtypeStruct((batch_pad, n), out_dtype),
        grid_spec=pltpu.PrefetchScalarGridSpec(
            num_scalar_prefetch=0,
            grid=grid,
            in_specs=[
                pl.BlockSpec((tm, k), lambda i: (i, 0)),   # x: row tile, K unpadded
                pl.BlockSpec((k, n), lambda i: (0, 0)),    # W: tiny, VMEM-resident
                pl.BlockSpec((1, n), lambda i: (0, 0)),    # b: tiny, VMEM-resident
            ],
            out_specs=pl.BlockSpec((tm, n), lambda i: (i, 0)),
        ),
        compiler_params=pltpu.CompilerParams(
            # Batch axis is embarrassingly parallel -> megacore sharding.
            dimension_semantics=("parallel",),
        ),
    )(x_in, w, b)

    if batch_pad != batch:
        out_p = out_p[:batch, :]
    return out_p


def init_params(key, input_features=2, output_features=4, hidden_units=8):
    """Deterministic init mimicking nn.Linear's U(-1/sqrt(fan_in), 1/sqrt(fan_in)).
    Weights stored as [in, out] (transposed vs. PyTorch's [out, in])."""
    ks = jax.random.split(key, 6)

    def lin(kw, kb, fan_in, fan_out):
        bound = 1.0 / (fan_in ** 0.5)
        w = jax.random.uniform(kw, (fan_in, fan_out), jnp.float32, -bound, bound)
        b = jax.random.uniform(kb, (1, fan_out), jnp.float32, -bound, bound)
        return w, b

    w1, b1 = lin(ks[0], ks[1], input_features, hidden_units)
    w2, b2 = lin(ks[2], ks[3], hidden_units, hidden_units)
    w3, b3 = lin(ks[4], ks[5], hidden_units, output_features)
    return {"w1": w1, "b1": b1, "w2": w2, "b2": b2, "w3": w3, "b3": b3}


def _reference(x, params):
    hp = jax.lax.Precision.HIGHEST
    h = jnp.dot(x, params["w1"], precision=hp) + params["b1"]
    h = jnp.dot(h, params["w2"], precision=hp) + params["b2"]
    return jnp.dot(h, params["w3"], precision=hp) + params["b3"]


if __name__ == "__main__":
    key = jax.random.PRNGKey(0)
    k_params, k_x = jax.random.split(key)

    input_features, output_features, hidden_units = 2, 4, 8
    batch = 8

    params = init_params(k_params, input_features, output_features, hidden_units)
    x = jax.random.normal(k_x, (batch, input_features), jnp.float32)

    out = jax.block_until_ready(blob_model_forward(x, params))
    ref = _reference(x, params)
    assert out.shape == (batch, output_features)
    assert jnp.allclose(out, ref, atol=1e-4, rtol=1e-4)

    # Ragged batch (row padding + 2-step grid) in f32.
    xb = jax.random.normal(jax.random.PRNGKey(1), (37, input_features), jnp.float32)
    out_b = jax.block_until_ready(blob_model_forward(xb, params))
    ref_b = _reference(xb, params)
    assert out_b.shape == (37, output_features)
    assert jnp.allclose(out_b, ref_b, atol=1e-4, rtol=1e-4)

    # Low-precision (bf16 operand) path recommended for v6e/v7x; f32 accumulate.
    out_bf16 = jax.block_until_ready(
        blob_model_forward(xb, params, compute_dtype=jnp.bfloat16))
    assert jnp.allclose(out_bf16, ref_b, atol=3e-2, rtol=3e-2)

    print("KERNEL_OK")
</pallas_src>

<mosaic_0001>
module attributes {stable_mosaic.version = 11 : i64} {
  func.func @affine_kernel(%arg0: i32, %arg1: memref<8x2xf32, #tpu.memory_space<vmem>>, %arg2: memref<2x4xf32, #tpu.memory_space<vmem>>, %arg3: memref<1x4xf32, #tpu.memory_space<vmem>>, %arg4: memref<8x4xf32, #tpu.memory_space<vmem>>) attributes {dimension_semantics = [#tpu.dimension_semantics<parallel>], iteration_bounds = array<i64: 1>, scalar_prefetch = 0 : i64, scratch_operands = 0 : i64, tpu.core_type = #tpu.core_type<tc>, window_params = [{transform_indices = @transform_0, window_bounds = array<i64: 8, 2>}, {pipeline_mode = #tpu.pipeline_mode<synchronous>, transform_indices = @transform_1, window_bounds = array<i64: 2, 4>}, {pipeline_mode = #tpu.pipeline_mode<synchronous>, transform_indices = @transform_2, window_bounds = array<i64: 1, 4>}, {transform_indices = @transform_3, window_bounds = array<i64: 8, 4>}]} {
    %c0 = arith.constant 0 : index
    %c0_0 = arith.constant 0 : index
    %0 = vector.load %arg1[%c0, %c0_0] : memref<8x2xf32, #tpu.memory_space<vmem>>, vector<8x2xf32>
    %c0_1 = arith.constant 0 : index
    %c0_2 = arith.constant 0 : index
    %1 = vector.load %arg2[%c0_1, %c0_2] : memref<2x4xf32, #tpu.memory_space<vmem>>, vector<2x4xf32>
    %c0_3 = arith.constant 0 : index
    %c0_4 = arith.constant 0 : index
    %2 = vector.load %arg3[%c0_3, %c0_4] : memref<1x4xf32, #tpu.memory_space<vmem>>, vector<1x4xf32>
    %3 = vector.shape_cast %2 : vector<1x4xf32> to vector<1x4xf32>
    %4 = vector.broadcast %3 : vector<1x4xf32> to vector<8x4xf32>
    %5 = vector.extract_strided_slice %0 {offsets = [0, 0], sizes = [8, 1], strides = [1, 1]} : vector<8x2xf32> to vector<8x1xf32>
    %6 = vector.extract_strided_slice %1 {offsets = [0, 0], sizes = [1, 4], strides = [1, 1]} : vector<2x4xf32> to vector<1x4xf32>
    %7 = vector.broadcast %5 : vector<8x1xf32> to vector<8x4xf32>
    %8 = vector.broadcast %6 : vector<1x4xf32> to vector<8x4xf32>
    %9 = arith.mulf %7, %8 : vector<8x4xf32>
    %10 = arith.addf %4, %9 : vector<8x4xf32>
    %11 = vector.extract_strided_slice %0 {offsets = [0, 1], sizes = [8, 1], strides = [1, 1]} : vector<8x2xf32> to vector<8x1xf32>
    %12 = vector.extract_strided_slice %1 {offsets = [1, 0], sizes = [1, 4], strides = [1, 1]} : vector<2x4xf32> to vector<1x4xf32>
    %13 = vector.broadcast %11 : vector<8x1xf32> to vector<8x4xf32>
    %14 = vector.broadcast %12 : vector<1x4xf32> to vector<8x4xf32>
    %15 = arith.mulf %13, %14 : vector<8x4xf32>
    %16 = arith.addf %10, %15 : vector<8x4xf32>
    %c0_5 = arith.constant 0 : index
    %c0_6 = arith.constant 0 : index
    %17 = vector.load %arg4[%c0_5, %c0_6] : memref<8x4xf32, #tpu.memory_space<vmem>>, vector<8x4xf32>
    tpu.vector_store %arg4[%c0_5, %c0_6], %16 {strides = array<i32>} : memref<8x4xf32, #tpu.memory_space<vmem>>, vector<8x4xf32>,
    return
  }
  func.func @transform_0(%arg0: i32) -> (i32, i32) {
    %c0_i32 = arith.constant 0 : i32
    %c0_i32_0 = arith.constant 0 : i32
    return %arg0, %c0_i32 : i32, i32
  }
  func.func @transform_1(%arg0: i32) -> (i32, i32) {
    %c0_i32 = arith.constant 0 : i32
    %c0_i32_0 = arith.constant 0 : i32
    %c0_i32_1 = arith.constant 0 : i32
    return %c0_i32, %c0_i32_0 : i32, i32
  }
  func.func @transform_2(%arg0: i32) -> (i32, i32) {
    %c0_i32 = arith.constant 0 : i32
    %c0_i32_0 = arith.constant 0 : i32
    %c0_i32_1 = arith.constant 0 : i32
    return %c0_i32, %c0_i32_0 : i32, i32
  }
  func.func @transform_3(%arg0: i32) -> (i32, i32) {
    %c0_i32 = arith.constant 0 : i32
    %c0_i32_0 = arith.constant 0 : i32
    return %arg0, %c0_i32 : i32, i32
  }
}

</mosaic_0001>

<bundles_post_ra>
// kernel: tpu_custom_call.1
= control target key start
LH: loop header
LB: loop body
LE: loop exit
PB: predicated region body
PF: predicated region fallthrough
CT: control target
= control target key end

     0   :  { %v46_v0 = vmov 0   ;;  %v47_v2 = vmov 1   ;;  %vm35_vm0 = vcmask 31744   ;;  %s80_s0 = inlined_call_operand.vmem [shape: f32[8,2], index: 0, kind: input, shape index: {}]   ;;  %s81_s2 = inlined_call_operand.vmem [shape: f32[1,4], index: 2, kind: input, shape index: {}]   ;;  %s82_s1 = inlined_call_operand.vmem [shape: f32[2,4], index: 1, kind: input, shape index: {}]   ;;  %s83_s3 = inlined_call_operand.vmem [shape: f32[8,4], index: 3, kind: output, shape index: {}]  }
   0x1   :  { %43 = vset.pattern.permute.xlu0 %v46_v0  ;;  %v14_v1 = vld [vmem:[%s80_s0] sm:$0xff] }
   0x2   :  { %22 = vperm.xlu0 %43, %v14_v1   ;;  %v15_v3 = vld [vmem:[%s82_s1] sm:$0x3] }
   0x3   :  { %v25_v5 = vperm.slane %v15_v3, 0  ;;  %v45_v6 = vld [vmem:[%s81_s2] ss:$0 sm:$0xff]  ;;  %v32_v8 = vperm.slane %v15_v3, 1 }
   0xa   :  { %44 = vset.pattern.permute.xlu0 %v47_v2 }
   0xb   :  { %29 = vperm.xlu0 %44, %v14_v1  }
  0x74   :  { %v23_v4 = vpop.permute.xlu0 %22 }
  0x75   :  { %v26_v7 = vmul.f32 %v25_v5, %v23_v4 }
  0x77   :  { %v27_v10 = vadd.f32 %v45_v6, %v26_v7 }
  0x7d   :  { %v30_v9 = vpop.permute.xlu0 %29 }
  0x7e   :  { %v33_v11 = vmul.f32 %v32_v8, %v30_v9 }
  0x80   :  { %v34_v12 = vadd.f32 %v33_v11, %v27_v10 }
  0x82   :  { %36 = vst.msk [vmem:[%s83_s3] sm:$0xff] %vm35_vm0, %v34_v12 }

</bundles_post_ra>
